<compile_context>
chip_gen: v7x
topology: tpu7x:2x2x1
jax: 0.10.0
libtpu: 0.0.40
codegen_flags: <defaults>
</compile_context>

<pallas_src>
import jax
import jax.numpy as jnp
from jax.experimental import pallas as pl
from jax.experimental.pallas import tpu as pltpu


def _round_up(x, m):
    return (x + m - 1) // m * m


# ----------------------------- Pallas kernel -------------------------------
def conv_bn_relu_kernel(x_ref, w_ref, b_ref, o_ref, acc_ref):
    # x_ref  : (TM, C)    one conv-tap slab of input rows for this M tile
    # w_ref  : (C, OCp)   tap weight with BN scale already folded in
    # b_ref  : (1, OCp)   BN folded bias
    # o_ref  : (TM, OCp)  output tile (resident across the tap axis)
    # acc_ref: (TM, OCp)  f32 accumulator scratch
    t = pl.program_id(1)

    @pl.when(t == 0)
    def _():
        acc_ref[...] = jnp.zeros_like(acc_ref)

    acc_ref[...] += jnp.dot(x_ref[...], w_ref[...],
                            preferred_element_type=jnp.float32)

    @pl.when(t == pl.num_programs(1) - 1)
    def _():
        y = acc_ref[...] + b_ref[...]
        o_ref[...] = jnp.maximum(y, 0.0).astype(o_ref.dtype)


def conv_bn_relu_pallas(taps, w_taps, bias, *, tm):
    # taps:   (T, Mp, C)   shifted input slabs (taps-major, channels last)
    # w_taps: (T, C, OCp)  per-tap weights, BN scale folded, OC zero-padded
    # bias:   (1, OCp)     BN folded bias, zero-padded
    T, Mp, C = taps.shape
    _, _, OCp = w_taps.shape
    grid = (Mp // tm, T)  # M tiles (parallel) x taps (reduction)
    return pl.pallas_call(
        conv_bn_relu_kernel,
        out_shape=jax.ShapeDtypeStruct((Mp, OCp), jnp.float32),
        grid_spec=pltpu.PrefetchScalarGridSpec(
            num_scalar_prefetch=0,
            grid=grid,
            in_specs=[
                pl.BlockSpec((None, tm, C), lambda m, t: (t, m, 0)),
                pl.BlockSpec((None, C, OCp), lambda m, t: (t, 0, 0)),
                pl.BlockSpec((1, OCp), lambda m, t: (0, 0)),
            ],
            out_specs=pl.BlockSpec((tm, OCp), lambda m, t: (m, 0)),
            scratch_shapes=[pltpu.VMEM((tm, OCp), jnp.float32)],
        ),
        compiler_params=pltpu.CompilerParams(
            dimension_semantics=("parallel", "arbitrary"),
            vmem_limit_bytes=32 * 1024 * 1024,
        ),
    )(taps, w_taps, bias)


# ----------------------------- JAX glue ------------------------------------
def basic_conv2d(x, weight, gamma, beta, running_mean, running_var,
                 eps=1e-3, tm=256):
    """Forward of BasicConv2d (inference-mode BatchNorm), stride=1 SAME conv."""
    N, C, H, W = x.shape
    OC, _, kh, kw = weight.shape
    ph, pw = kh // 2, kw // 2  # SAME padding for odd kernels, stride=1

    # NHWC + halo pad; build taps-major shifted slabs so the lane dim is C.
    x_nhwc = jnp.transpose(x, (0, 2, 3, 1))
    xp = jnp.pad(x_nhwc, ((0, 0), (ph, ph), (pw, pw), (0, 0)))
    M = N * H * W
    slabs = [xp[:, i:i + H, j:j + W, :].reshape(M, C)
             for i in range(kh) for j in range(kw)]
    taps = jnp.stack(slabs, axis=0)                       # (T, M, C)

    # Fold inference BatchNorm: scale into the weight, keep only the bias.
    scale = gamma / jnp.sqrt(running_var + eps)           # (OC,)
    bias = beta - running_mean * scale                    # (OC,)
    w_taps = jnp.transpose(weight, (2, 3, 1, 0)).reshape(kh * kw, C, OC)
    w_taps = w_taps * scale[None, None, :]                # (T, C, OC)

    # Pad OC to the 128-lane width and M to the row-tile size.
    OCp = _round_up(OC, 128)
    tm = min(tm, _round_up(M, 8))
    Mp = _round_up(M, tm)
    taps = jnp.pad(taps, ((0, 0), (0, Mp - M), (0, 0)))
    w_taps = jnp.pad(w_taps, ((0, 0), (0, 0), (0, OCp - OC)))
    bias_p = jnp.pad(bias, (0, OCp - OC)).reshape(1, OCp)

    out = conv_bn_relu_pallas(taps, w_taps, bias_p, tm=tm)  # (Mp, OCp)
    out = out[:M, :OC].reshape(N, H, W, OC)
    return jnp.transpose(out, (0, 3, 1, 2))                 # back to NCHW

    # TODO(synk): training-mode BatchNorm (batch statistics + running-stat update)
    # is not implemented; only inference-mode BN (folded affine) is supported.


# ----------------------------- reference -----------------------------------
def basic_conv2d_ref(x, weight, gamma, beta, running_mean, running_var, eps=1e-3):
    y = jax.lax.conv_general_dilated(
        x, weight, window_strides=(1, 1), padding="SAME",
        dimension_numbers=("NCHW", "OIHW", "NCHW"),
        preferred_element_type=jnp.float32,
    )
    scale = gamma / jnp.sqrt(running_var + eps)
    bias = beta - running_mean * scale
    y = y * scale[None, :, None, None] + bias[None, :, None, None]
    return jnp.maximum(y, 0.0)


# ----------------------------- main -----------------------------------------
if __name__ == "__main__":
    key = jax.random.PRNGKey(0)

    # Small shapes consistent with the module: N=2, C_in=4, H=W=16, C_out=8, 3x3 conv.
    N, C, H, W = 2, 4, 16, 16
    OC, kh, kw = 8, 3, 3
    eps = 0.001

    kx, kw_ = jax.random.split(key)
    x = jax.random.normal(kx, (N, C, H, W), dtype=jnp.float32)
    weight = jax.random.normal(kw_, (OC, C, kh, kw), dtype=jnp.float32) * 0.1

    # Deterministic, non-trivial BatchNorm parameters / running stats.
    gamma = 1.0 + 0.1 * jnp.arange(OC, dtype=jnp.float32)
    beta = 0.05 * jnp.arange(OC, dtype=jnp.float32)
    running_mean = 0.01 * jnp.arange(OC, dtype=jnp.float32)
    running_var = 1.0 + 0.02 * jnp.arange(OC, dtype=jnp.float32)

    fwd = jax.jit(basic_conv2d)
    out = fwd(x, weight, gamma, beta, running_mean, running_var, eps)
    out = jax.block_until_ready(out)

    ref = basic_conv2d_ref(x, weight, gamma, beta, running_mean, running_var, eps)
    assert out.shape == (N, OC, H, W), out.shape
    assert jnp.allclose(out, ref, rtol=1e-4, atol=1e-4), "mismatch vs reference"

    print("KERNEL_OK")
</pallas_src>

<mosaic_0001>
module attributes {stable_mosaic.version = 11 : i64} {
  func.func @conv_bn_relu_kernel(%arg0: i32, %arg1: i32, %arg2: memref<1x256x4xf32, #tpu.memory_space<vmem>>, %arg3: memref<1x4x128xf32, #tpu.memory_space<vmem>>, %arg4: memref<1x128xf32, #tpu.memory_space<vmem>>, %arg5: memref<256x128xf32, #tpu.memory_space<vmem>>, %arg6: memref<256x128xf32, #tpu.memory_space<vmem>>) attributes {dimension_semantics = [#tpu.dimension_semantics<parallel>, #tpu.dimension_semantics<arbitrary>], iteration_bounds = array<i64: 2, 9>, scalar_prefetch = 0 : i64, scratch_operands = 1 : i64, tpu.core_type = #tpu.core_type<tc>, window_params = [{transform_indices = @transform_0, window_bounds = array<i64: 1, 256, 4>}, {transform_indices = @transform_1, window_bounds = array<i64: 1, 4, 128>}, {pipeline_mode = #tpu.pipeline_mode<synchronous>, transform_indices = @transform_2, window_bounds = array<i64: 1, 128>}, {transform_indices = @transform_3, window_bounds = array<i64: 256, 128>}]} {
    %c0_i32 = arith.constant 0 : i32
    %0 = arith.cmpi eq, %arg1, %c0_i32 : i32
    %1 = arith.extui %0 : i1 to i32
    %c0_i32_0 = arith.constant 0 : i32
    %2 = arith.cmpi ne, %1, %c0_i32_0 : i32
    scf.if %2 {
      %cst_11 = arith.constant 0.000000e+00 : f32
      %14 = vector.broadcast %cst_11 : f32 to vector<256x128xf32>
      %c0_12 = arith.constant 0 : index
      %c0_13 = arith.constant 0 : index
      %15 = vector.load %arg6[%c0_12, %c0_13] : memref<256x128xf32, #tpu.memory_space<vmem>>, vector<256x128xf32>
      tpu.vector_store %arg6[%c0_12, %c0_13], %14 {strides = array<i32>} : memref<256x128xf32, #tpu.memory_space<vmem>>, vector<256x128xf32>,
    } else {
    }
    %c0 = arith.constant 0 : index
    %c0_1 = arith.constant 0 : index
    %3 = vector.load %arg6[%c0, %c0_1] : memref<256x128xf32, #tpu.memory_space<vmem>>, vector<256x128xf32>
    %c0_2 = arith.constant 0 : index
    %c0_3 = arith.constant 0 : index
    %c0_4 = arith.constant 0 : index
    %4 = vector.load %arg2[%c0_2, %c0_3, %c0_4] : memref<1x256x4xf32, #tpu.memory_space<vmem>>, vector<1x256x4xf32>
    %5 = vector.shape_cast %4 : vector<1x256x4xf32> to vector<256x4xf32>
    %c0_5 = arith.constant 0 : index
    %c0_6 = arith.constant 0 : index
    %c0_7 = arith.constant 0 : index
    %6 = vector.load %arg3[%c0_5, %c0_6, %c0_7] : memref<1x4x128xf32, #tpu.memory_space<vmem>>, vector<1x4x128xf32>
    %7 = vector.shape_cast %6 : vector<1x4x128xf32> to vector<4x128xf32>
    %cst = arith.constant dense<0.000000e+00> : vector<256x128xf32>
    %8 = tpu.matmul %5, %7, %cst {dimension_numbers = #tpu.dot_dimension_numbers<[1], [0], [0], [1], [0, 0, 1, 1], [], []>} : vector<256x4xf32>, vector<4x128xf32>, vector<256x128xf32> -> vector<256x128xf32>
    %9 = arith.addf %3, %8 : vector<256x128xf32>
    %c0_8 = arith.constant 0 : index
    %c0_9 = arith.constant 0 : index
    %10 = vector.load %arg6[%c0_8, %c0_9] : memref<256x128xf32, #tpu.memory_space<vmem>>, vector<256x128xf32>
    tpu.vector_store %arg6[%c0_8, %c0_9], %9 {strides = array<i32>} : memref<256x128xf32, #tpu.memory_space<vmem>>, vector<256x128xf32>,
    %c8_i32 = arith.constant 8 : i32
    %11 = arith.cmpi eq, %arg1, %c8_i32 : i32
    %12 = arith.extui %11 : i1 to i32
    %c0_i32_10 = arith.constant 0 : i32
    %13 = arith.cmpi ne, %12, %c0_i32_10 : i32
    scf.if %13 {
      %c0_11 = arith.constant 0 : index
      %c0_12 = arith.constant 0 : index
      %14 = vector.load %arg6[%c0_11, %c0_12] : memref<256x128xf32, #tpu.memory_space<vmem>>, vector<256x128xf32>
      %c0_13 = arith.constant 0 : index
      %c0_14 = arith.constant 0 : index
      %15 = vector.load %arg4[%c0_13, %c0_14] : memref<1x128xf32, #tpu.memory_space<vmem>>, vector<1x128xf32>
      %16 = vector.broadcast %15 : vector<1x128xf32> to vector<256x128xf32>
      %17 = arith.addf %14, %16 : vector<256x128xf32>
      %cst_15 = arith.constant 0.000000e+00 : f32
      %18 = vector.broadcast %cst_15 : f32 to vector<256x128xf32>
      %19 = arith.maximumf %17, %18 : vector<256x128xf32>
      %c0_16 = arith.constant 0 : index
      %c0_17 = arith.constant 0 : index
      %20 = vector.load %arg5[%c0_16, %c0_17] : memref<256x128xf32, #tpu.memory_space<vmem>>, vector<256x128xf32>
      tpu.vector_store %arg5[%c0_16, %c0_17], %19 {strides = array<i32>} : memref<256x128xf32, #tpu.memory_space<vmem>>, vector<256x128xf32>,
    } else {
    }
    return
  }
  func.func @transform_0(%arg0: i32, %arg1: i32) -> (i32, i32, i32) {
    %c0_i32 = arith.constant 0 : i32
    %c0_i32_0 = arith.constant 0 : i32
    return %arg1, %arg0, %c0_i32 : i32, i32, i32
  }
  func.func @transform_1(%arg0: i32, %arg1: i32) -> (i32, i32, i32) {
    %c0_i32 = arith.constant 0 : i32
    %c0_i32_0 = arith.constant 0 : i32
    %c0_i32_1 = arith.constant 0 : i32
    return %arg1, %c0_i32, %c0_i32_0 : i32, i32, i32
  }
  func.func @transform_2(%arg0: i32, %arg1: i32) -> (i32, i32) {
    %c0_i32 = arith.constant 0 : i32
    %c0_i32_0 = arith.constant 0 : i32
    %c0_i32_1 = arith.constant 0 : i32
    return %c0_i32, %c0_i32_0 : i32, i32
  }
  func.func @transform_3(%arg0: i32, %arg1: i32) -> (i32, i32) {
    %c0_i32 = arith.constant 0 : i32
    %c0_i32_0 = arith.constant 0 : i32
    return %arg0, %c0_i32 : i32, i32
  }
}

</mosaic_0001>

<bundles_post_ra>
// kernel: basic_conv2d.1
= control target key start
LH: loop header
LB: loop body
LE: loop exit
PB: predicated region body
PF: predicated region fallthrough
CT: control target
= control target key end

     0   :  { %s1169_s12 = smov 0   ;;  %s1171_s13 = smov 0   ;;  %s1369_s0 = inlined_call_operand.vmem [shape: f32[9,512,4], index: 0, kind: input, shape index: {}]   ;;  %s1370_s1 = inlined_call_operand.vmem [shape: f32[9,4,128], index: 1, kind: input, shape index: {}]   ;;  %s1371_s2 = inlined_call_operand.vmem [shape: f32[1,128], index: 2, kind: input, shape index: {}]   ;;  %s1372_s3 = inlined_call_operand.vmem [shape: f32[512,128], index: 3, kind: output, shape index: {}]  }
   0x1   :  { %s1173_s14 = smov 0   ;;  %s1175_s15 = smov 0  }
   0x2   :  { %s1177_s16 = smov 0  }
   0x3 LB: > { %s22_s17 = sadd.s32 1, %s1138_s14  ;;  %s25_s18 = sadd.s32 1, %s1142_s15  ;;  %s1146_s16 = sphi %s1177_s16, %s13_s16   ;;  %s1142_s15 = sphi %s1175_s15, %s1376_s15   ;;  %s1138_s14 = sphi %s1173_s14, %s1375_s14   ;;  %s1134_s13 = sphi %s1171_s13, %s1374_s13   ;;  %s1130_s12 = sphi %s1169_s12, %s1373_s12  }
   0x4   : > { %p23_p0 = scmp.ge.s32.totalorder %s22_s17, 9  ;;  %p937_p1 = scmp.ge.s32.totalorder %s1146_s16, 1 }
   0x5   : > { %p165_p2 = scmp.lt.s32.totalorder %s1146_s16, 19 }
   0x6   : > { %s1378_s17 = smov (%p23_p0, %s22_s17), 0  ;;  %s1380_s18 = smov (!%p23_p0, %s25_s18), %s1142_s15 }
   0x7   : > { %p166_p3 = pnand %p937_p1, %p165_p2  ;;  %p27_p4 = scmp.ge.s32.totalorder %s1380_s18, 2 }
   0x8   : > { %s938_s19 = sshll.u32 (!%p166_p3), %s1134_s13, 5  ;;  %p198_p5 = scmp.lt.s32.totalorder (!%p166_p3), %s1130_s12, 8 }
   0x9   : > { %s1382_s18 = smov (%p27_p4, %s1380_s18), 0  ;;  %169 = sbr.rel (%p166_p3) target bundleno = 296 (0x128), region = 32 }
   0xa   : > { %p200_p6 = scmp.lt.s32.totalorder (!%p166_p3), %s938_s19, 63  ;;  %p944_p7 = scmp.ne.s32.totalorder (!%p166_p3), %s1130_s12, 0 }
  0x10   : > { %s199_s20 = scalar_select %p198_p5, %s1130_s12, 8 }
  0x11   : > { %s1384_s19 = smov (!%p200_p6, %s938_s19), 63  ;;  %220 = sbr.rel (%p944_p7) target bundleno = 35 (0x23), region = 36 }
  0x12   : > { %s939_s21 = sshll.u32 %s199_s20, 6  ;;  %s941_s22 = sshll.u32 %s199_s20, 2  ;;  %v1148_v0 = vmov (!%p944_p7), 0.0  }
  0x13   : > { %s203_s23 = sadd.s32 %s939_s21, %s1384_s19  ;;  %s1206_s26 = scalar_lea.vmem %s1370_s1, %s941_s22  ;;  %221 = vst [vmem:[#allocation2] sm:$0xff] (!%p944_p7), %v1148_v0  ;;  %222 = vst [vmem:[#allocation2 + $0x8] sm:$0xff] (!%p944_p7), %v1148_v0 }
  0x14   : > { %s940_s27 = sshll.u32 %s203_s23, 3  ;;  %s943_s28 = sshll.u32 %s1384_s19, 3  ;;  %223 = vst [vmem:[#allocation2 + $0x10] sm:$0xff] (!%p944_p7), %v1148_v0  ;;  %224 = vst [vmem:[#allocation2 + $0x18] sm:$0xff] (!%p944_p7), %v1148_v0 }
  0x15   : > { %s1211_s4 = scalar_lea.vmem %s1369_s0, %s940_s27  ;;  %s1216_s7 = scalar_lea.vmem %s1372_s3, %s943_s28  ;;  %225 = vst [vmem:[#allocation2 + $0x20] sm:$0xff] (!%p944_p7), %v1148_v0  ;;  %226 = vst [vmem:[#allocation2 + $0x28] sm:$0xff] (!%p944_p7), %v1148_v0 }
  0x16   : > { %227 = vst [vmem:[#allocation2 + $0x30] sm:$0xff] (!%p944_p7), %v1148_v0  ;;  %228 = vst [vmem:[#allocation2 + $0x38] sm:$0xff] (!%p944_p7), %v1148_v0 }
  0x17   : > { %229 = vst [vmem:[#allocation2 + $0x40] sm:$0xff] (!%p944_p7), %v1148_v0  ;;  %230 = vst [vmem:[#allocation2 + $0x48] sm:$0xff] (!%p944_p7), %v1148_v0 }
  0x18   : > { %231 = vst [vmem:[#allocation2 + $0x50] sm:$0xff] %v1148_v0  ;;  %232 = vst [vmem:[#allocation2 + $0x58] sm:$0xff] %v1148_v0 }
  0x19   : > { %233 = vst [vmem:[#allocation2 + $0x60] sm:$0xff] %v1148_v0  ;;  %234 = vst [vmem:[#allocation2 + $0x68] sm:$0xff] %v1148_v0 }
  0x1a   : > { %235 = vst [vmem:[#allocation2 + $0x70] sm:$0xff] %v1148_v0  ;;  %236 = vst [vmem:[#allocation2 + $0x78] sm:$0xff] %v1148_v0 }
  0x1b   : > { %237 = vst [vmem:[#allocation2 + $0x80] sm:$0xff] %v1148_v0  ;;  %238 = vst [vmem:[#allocation2 + $0x88] sm:$0xff] %v1148_v0 }
  0x1c   : > { %239 = vst [vmem:[#allocation2 + $0x90] sm:$0xff] %v1148_v0  ;;  %240 = vst [vmem:[#allocation2 + $0x98] sm:$0xff] %v1148_v0 }
  0x1d   : > { %241 = vst [vmem:[#allocation2 + $0xa0] sm:$0xff] %v1148_v0  ;;  %242 = vst [vmem:[#allocation2 + $0xa8] sm:$0xff] %v1148_v0 }
  0x1e   : > { %243 = vst [vmem:[#allocation2 + $0xb0] sm:$0xff] %v1148_v0  ;;  %244 = vst [vmem:[#allocation2 + $0xb8] sm:$0xff] %v1148_v0 }
  0x1f   : > { %245 = vst [vmem:[#allocation2 + $0xc0] sm:$0xff] %v1148_v0  ;;  %246 = vst [vmem:[#allocation2 + $0xc8] sm:$0xff] %v1148_v0 }
  0x20   : > { %247 = vst [vmem:[#allocation2 + $0xd0] sm:$0xff] %v1148_v0  ;;  %248 = vst [vmem:[#allocation2 + $0xd8] sm:$0xff] %v1148_v0 }
  0x21   : > { %249 = vst [vmem:[#allocation2 + $0xe0] sm:$0xff] %v1148_v0  ;;  %250 = vst [vmem:[#allocation2 + $0xe8] sm:$0xff] %v1148_v0 }
  0x22   : > { %251 = vst [vmem:[#allocation2 + $0xf0] sm:$0xff] %v1148_v0  ;;  %252 = vst [vmem:[#allocation2 + $0xf8] sm:$0xff] %v1148_v0 }
  0x23 PF: > { %v317_v1 = vld [vmem:[%s1206_s26] sm:$0xf]  ;;  %vm415_vm0 = vcmask 1043456   ;;  %vm318_vm1 = vcmask 31744   ;;  %v286_v4 = vld [vmem:[%s1211_s4 + $0x8] sm:$0xff]  ;;  %v287_v6 = vld [vmem:[%s1211_s4 + $0x10] sm:$0xff] }
  0x24   : > { %v285_v2 = vld [vmem:[%s1211_s4] sm:$0xff]  ;;  %1015 = vmatprep.subr.msk.mxu0 %vm415_vm0, %v317_v1  ;;  %1065 = vmatprep.subr.msk.mxu1 %vm415_vm0, %v317_v1  ;;  %v302_v5 = vld [vmem:[%s1211_s4 + $0x88] sm:$0xff]  ;;  %v303_v7 = vld [vmem:[%s1211_s4 + $0x90] sm:$0xff]  ;;  %p978_p8 = scmp.ne.s32.totalorder %s1130_s12, 8 }
  0x25   : > { %v301_v3 = vld [vmem:[%s1211_s4 + $0x80] sm:$0xff]  ;;  %1016 = vmatpush3.msk.msra.mxu0 %vm415_vm0, %v317_v1  ;;  %1066 = vmatpush3.msk.msra.mxu1 %vm415_vm0, %v317_v1  ;;  %v288_v8 = vld [vmem:[%s1211_s4 + $0x18] sm:$0xff]  ;;  %v290_v12 = vld [vmem:[%s1211_s4 + $0x28] sm:$0xff] }
  0x26   : > { %1017 = vmatprep.mubr.msk.f32.mxu0 %vm318_vm1, %v285_v2  ;;  %1041 = vmatprep.mubr.msk.f32.mxu1 %vm318_vm1, %v301_v3  ;;  %v304_v9 = vld [vmem:[%s1211_s4 + $0x98] sm:$0xff]  ;;  %v289_v10 = vld [vmem:[%s1211_s4 + $0x20] sm:$0xff]  ;;  %v306_v13 = vld [vmem:[%s1211_s4 + $0xa8] sm:$0xff] }
  0x27   : > { %1018 = vmatmul.mubr.msk.f32.vlgmr.msra.gmra.mrb[0].mxu0 %vm318_vm1, %v286_v4  ;;  %1042 = vmatmul.mubr.msk.f32.vlgmr.msra.gmra.mrb[0].mxu1 %vm318_vm1, %v302_v5  ;;  %v305_v11 = vld [vmem:[%s1211_s4 + $0xa0] sm:$0xff]  ;;  %v291_v14 = vld [vmem:[%s1211_s4 + $0x30] sm:$0xff]  ;;  %v292_v16 = vld [vmem:[%s1211_s4 + $0x38] sm:$0xff] }
  0x28   : > { %1020 = vmatprep.mubr.msk.f32.mxu0 %vm318_vm1, %v287_v6  ;;  %1044 = vmatprep.mubr.msk.f32.mxu1 %vm318_vm1, %v303_v7  ;;  %v307_v15 = vld [vmem:[%s1211_s4 + $0xb0] sm:$0xff]  ;;  %v308_v17 = vld [vmem:[%s1211_s4 + $0xb8] sm:$0xff]  ;;  %v293_v18 = vld [vmem:[%s1211_s4 + $0x40] sm:$0xff] }
  0x29   : > { %v309_v19 = vld [vmem:[%s1211_s4 + $0xc0] sm:$0xff]  ;;  %v294_v20 = vld [vmem:[%s1211_s4 + $0x48] sm:$0xff]  ;;  %v295_v22 = vld [vmem:[%s1211_s4 + $0x50] sm:$0xff] }
  0x2a   : > { %v310_v21 = vld [vmem:[%s1211_s4 + $0xc8] sm:$0xff]  ;;  %v311_v23 = vld [vmem:[%s1211_s4 + $0xd0] sm:$0xff]  ;;  %v296_v24 = vld [vmem:[%s1211_s4 + $0x58] sm:$0xff] }
  0x2b   : > { %1021 = vmatmul.mubr.msk.f32.gmra.mrb[2].mxu0 %vm318_vm1, %v288_v8  ;;  %1045 = vmatmul.mubr.msk.f32.gmra.mrb[2].mxu1 %vm318_vm1, %v304_v9  ;;  %v312_v25 = vld [vmem:[%s1211_s4 + $0xd8] sm:$0xff]  ;;  %v297_v26 = vld [vmem:[%s1211_s4 + $0x60] sm:$0xff]  ;;  %v298_v28 = vld [vmem:[%s1211_s4 + $0x68] sm:$0xff] }
  0x2c   : > { %1023 = vmatprep.mubr.msk.f32.mxu0 %vm318_vm1, %v289_v10  ;;  %1047 = vmatprep.mubr.msk.f32.mxu1 %vm318_vm1, %v305_v11  ;;  %v313_v27 = vld [vmem:[%s1211_s4 + $0xe0] sm:$0xff]  ;;  %v314_v29 = vld [vmem:[%s1211_s4 + $0xe8] sm:$0xff]  ;;  %v299_v30 = vld [vmem:[%s1211_s4 + $0x70] sm:$0xff] }
  0x2d   : > { %v315_v31 = vld [vmem:[%s1211_s4 + $0xf0] sm:$0xff]  ;;  %v300_v32 = vld [vmem:[%s1211_s4 + $0x78] sm:$0xff]  ;;  %v254_v34 = vld [vmem:[#allocation2 + $0x8] sm:$0xff] }
  0x2e   : > { %v316_v33 = vld [vmem:[%s1211_s4 + $0xf8] sm:$0xff]  ;;  %v270_v35 = vld [vmem:[#allocation2 + $0x88] sm:$0xff]  ;;  %v253_v36 = vld [vmem:[#allocation2] sm:$0xff] }
  0x2f   : > { %1024 = vmatmul.mubr.msk.f32.gmra.mrb[4].mxu0 %vm318_vm1, %v290_v12  ;;  %1048 = vmatmul.mubr.msk.f32.gmra.mrb[4].mxu1 %vm318_vm1, %v306_v13  ;;  %v269_v37 = vld [vmem:[#allocation2 + $0x80] sm:$0xff]  ;;  %v256_v46 = vld [vmem:[#allocation2 + $0x18] sm:$0xff]  ;;  %v255_v48 = vld [vmem:[#allocation2 + $0x10] sm:$0xff] }
  0x30   : > { %1026 = vmatprep.mubr.msk.f32.mxu0 %vm318_vm1, %v291_v14  ;;  %1050 = vmatprep.mubr.msk.f32.mxu1 %vm318_vm1, %v307_v15  ;;  %v272_v47 = vld [vmem:[#allocation2 + $0x98] sm:$0xff]  ;;  %v271_v49 = vld [vmem:[#allocation2 + $0x90] sm:$0xff]  ;;  %v258_v58 = vld [vmem:[#allocation2 + $0x28] sm:$0xff] }
  0x31   : > { %v274_v59 = vld [vmem:[#allocation2 + $0xa8] sm:$0xff]  ;;  %v257_v60 = vld [vmem:[#allocation2 + $0x20] sm:$0xff]  ;;  %v260_v6 = vld [vmem:[#allocation2 + $0x38] sm:$0xff] }
  0x32   : > { %v273_v61 = vld [vmem:[#allocation2 + $0xa0] sm:$0xff]  ;;  %v276_v7 = vld [vmem:[#allocation2 + $0xb8] sm:$0xff]  ;;  %v259_v8 = vld [vmem:[#allocation2 + $0x30] sm:$0xff] }
  0x33   : > { %1027 = vmatmul.mubr.msk.f32.gmra.mrb[6].mxu0 %vm318_vm1, %v292_v16  ;;  %1051 = vmatmul.mubr.msk.f32.gmra.mrb[6].mxu1 %vm318_vm1, %v308_v17  ;;  %v275_v9 = vld [vmem:[#allocation2 + $0xb0] sm:$0xff] }
  0x34   : > { %1029 = vmatprep.mubr.msk.f32.mxu0 %vm318_vm1, %v293_v18  ;;  %1053 = vmatprep.mubr.msk.f32.mxu1 %vm318_vm1, %v309_v19  ;;  %v262_v18 = vld [vmem:[#allocation2 + $0x48] sm:$0xff] }
  0x35   : > { %v278_v19 = vld [vmem:[#allocation2 + $0xc8] sm:$0xff] }
  0x37   : > { %1030 = vmatmul.mubr.msk.f32.gmra.mrb[8].mxu0 %vm318_vm1, %v294_v20  ;;  %1054 = vmatmul.mubr.msk.f32.gmra.mrb[8].mxu1 %vm318_vm1, %v310_v21  ;;  %v261_v20 = vld [vmem:[#allocation2 + $0x40] sm:$0xff] }
  0x38   : > { %1032 = vmatprep.mubr.msk.f32.mxu0 %vm318_vm1, %v295_v22  ;;  %1056 = vmatprep.mubr.msk.f32.mxu1 %vm318_vm1, %v311_v23  ;;  %v277_v21 = vld [vmem:[#allocation2 + $0xc0] sm:$0xff] }
  0x3b   : > { %1033 = vmatmul.mubr.msk.f32.gmra.mrb[10].mxu0 %vm318_vm1, %v296_v24  ;;  %1057 = vmatmul.mubr.msk.f32.gmra.mrb[10].mxu1 %vm318_vm1, %v312_v25 }
  0x3c   : > { %1035 = vmatprep.mubr.msk.f32.mxu0 %vm318_vm1, %v297_v26  ;;  %1059 = vmatprep.mubr.msk.f32.mxu1 %vm318_vm1, %v313_v27 }
  0x3f   : > { %1036 = vmatmul.mubr.msk.f32.gmra.mrb[12].mxu0 %vm318_vm1, %v298_v28  ;;  %1060 = vmatmul.mubr.msk.f32.gmra.mrb[12].mxu1 %vm318_vm1, %v314_v29 }
  0x40   : > { %1038 = vmatprep.mubr.msk.f32.mxu0 %vm318_vm1, %v299_v30  ;;  %1062 = vmatprep.mubr.msk.f32.mxu1 %vm318_vm1, %v315_v31  ;;  %v264_v30 = vld [vmem:[#allocation2 + $0x58] sm:$0xff] }
  0x41   : > { %v280_v31 = vld [vmem:[#allocation2 + $0xd8] sm:$0xff] }
  0x43   : > { %1039 = vmatmul.mubr.msk.f32.gmra.mrb[14].mxu0 %vm318_vm1, %v300_v32  ;;  %1063 = vmatmul.mubr.msk.f32.gmra.mrb[14].mxu1 %vm318_vm1, %v316_v33  ;;  %v263_v32 = vld [vmem:[#allocation2 + $0x50] sm:$0xff] }
  0x44   : > { %v279_v33 = vld [vmem:[#allocation2 + $0xd0] sm:$0xff] }
  0xfa   : > { %v1019_v38 = vpop.f32.mrb[0].mxu0  ;;  %v1043_v39 = vpop.f32.mrb[0].mxu1 }
  0xfb   : > { %v645_v40 = vadd.f32 %v1019_v38, %v254_v34  ;;  %v661_v41 = vadd.f32 %v1043_v39, %v270_v35  ;;  %v485_v42 = vpop.f32.mrb[1].mxu0  ;;  %v565_v43 = vpop.f32.mrb[1].mxu1 }
  0xfc   : > { %v644_v44 = vadd.f32 %v485_v42, %v253_v36  ;;  %v660_v45 = vadd.f32 %v565_v43, %v269_v37  ;;  %v266_v42 = vld [vmem:[#allocation2 + $0x68] sm:$0xff] }
  0xfd   : > { %677 = vst [vmem:[#allocation2 + $0x8] sm:$0xff] %v645_v40  ;;  %693 = vst [vmem:[#allocation2 + $0x88] sm:$0xff] %v661_v41  ;;  %v282_v43 = vld [vmem:[#allocation2 + $0xe8] sm:$0xff] }
  0xfe   : > { %676 = vst [vmem:[#allocation2] sm:$0xff] %v644_v44  ;;  %692 = vst [vmem:[#allocation2 + $0x80] sm:$0xff] %v660_v45  ;;  %v1022_v50 = vpop.f32.mrb[2].mxu0  ;;  %v1046_v51 = vpop.f32.mrb[2].mxu1  ;;  %v265_v44 = vld [vmem:[#allocation2 + $0x60] sm:$0xff] }
  0xff   : > { %v647_v52 = vadd.f32 %v1022_v50, %v256_v46  ;;  %v663_v53 = vadd.f32 %v1046_v51, %v272_v47  ;;  %v495_v54 = vpop.f32.mrb[3].mxu0  ;;  %v575_v55 = vpop.f32.mrb[3].mxu1  ;;  %v281_v45 = vld [vmem:[#allocation2 + $0xe0] sm:$0xff] }
 0x100   : > { %v646_v56 = vadd.f32 %v495_v54, %v255_v48  ;;  %v662_v57 = vadd.f32 %v575_v55, %v271_v49  ;;  %v268_v54 = vld [vmem:[#allocation2 + $0x78] sm:$0xff] }
 0x101   : > { %679 = vst [vmem:[#allocation2 + $0x18] sm:$0xff] %v647_v52  ;;  %695 = vst [vmem:[#allocation2 + $0x98] sm:$0xff] %v663_v53  ;;  %v284_v55 = vld [vmem:[#allocation2 + $0xf8] sm:$0xff] }
 0x102   : > { %678 = vst [vmem:[#allocation2 + $0x10] sm:$0xff] %v646_v56  ;;  %694 = vst [vmem:[#allocation2 + $0x90] sm:$0xff] %v662_v57  ;;  %v1025_v62 = vpop.f32.mrb[4].mxu0  ;;  %v1049_v63 = vpop.f32.mrb[4].mxu1  ;;  %v267_v56 = vld [vmem:[#allocation2 + $0x70] sm:$0xff] }
 0x103   : > { %v649_v0 = vadd.f32 %v1025_v62, %v258_v58  ;;  %v665_v1 = vadd.f32 %v1049_v63, %v274_v59  ;;  %v505_v2 = vpop.f32.mrb[5].mxu0  ;;  %v585_v3 = vpop.f32.mrb[5].mxu1  ;;  %v283_v57 = vld [vmem:[#allocation2 + $0xf0] sm:$0xff] }
 0x104   : > { %v648_v4 = vadd.f32 %v505_v2, %v257_v60  ;;  %v664_v5 = vadd.f32 %v585_v3, %v273_v61  ;;  %v1288_v3 = vld [vmem:[%s1371_s2] ss:$0 sm:$0xff] (!%p978_p8) }
 0x105   : > { %681 = vst [vmem:[#allocation2 + $0x28] sm:$0xff] %v649_v0  ;;  %697 = vst [vmem:[#allocation2 + $0xa8] sm:$0xff] %v665_v1  ;;  %v712_v2 = vld [vmem:[#allocation2] sm:$0xff] (!%p978_p8) }
 0x106   : > { %680 = vst [vmem:[#allocation2 + $0x20] sm:$0xff] %v648_v4  ;;  %696 = vst [vmem:[#allocation2 + $0xa0] sm:$0xff] %v664_v5  ;;  %v1028_v10 = vpop.f32.mrb[6].mxu0  ;;  %v1052_v11 = vpop.f32.mrb[6].mxu1  ;;  %v713_v4 = vld [vmem:[#allocation2 + $0x8] sm:$0xff] (!%p978_p8)  ;;  %v751_v5 = vadd.f32 (!%p978_p8), %v1288_v3, %v712_v2 }
 0x107   : > { %v651_v12 = vadd.f32 %v1028_v10, %v260_v6  ;;  %v667_v13 = vadd.f32 %v1052_v11, %v276_v7  ;;  %v515_v14 = vpop.f32.mrb[7].mxu0  ;;  %v595_v15 = vpop.f32.mrb[7].mxu1  ;;  %v752_v6 = vadd.f32 (!%p978_p8), %v1288_v3, %v713_v4 }
 0x108   : > { %v650_v16 = vadd.f32 %v515_v14, %v259_v8  ;;  %v666_v17 = vadd.f32 %v595_v15, %v275_v9  ;;  %v715_v8 = vld [vmem:[#allocation2 + $0x18] sm:$0xff] (!%p978_p8) }
 0x109   : > { %683 = vst [vmem:[#allocation2 + $0x38] sm:$0xff] %v651_v12  ;;  %699 = vst [vmem:[#allocation2 + $0xb8] sm:$0xff] %v667_v13  ;;  %v714_v7 = vld [vmem:[#allocation2 + $0x10] sm:$0xff] (!%p978_p8)  ;;  %v754_v11 = vadd.f32 (!%p978_p8), %v1288_v3, %v715_v8 }
 0x10a   : > { %682 = vst [vmem:[#allocation2 + $0x30] sm:$0xff] %v650_v16  ;;  %698 = vst [vmem:[#allocation2 + $0xb0] sm:$0xff] %v666_v17  ;;  %v1031_v22 = vpop.f32.mrb[8].mxu0  ;;  %v1055_v23 = vpop.f32.mrb[8].mxu1  ;;  %v753_v10 = vadd.f32 (!%p978_p8), %v1288_v3, %v714_v7  ;;  %v783_v16 = vmax.f32 (!%p978_p8), %v751_v5, 0.0  ;;  %v784_v17 = vmax.f32 (!%p978_p8), %v752_v6, 0.0 }
 0x10b   : > { %v653_v24 = vadd.f32 %v1031_v22, %v262_v18  ;;  %v669_v25 = vadd.f32 %v1055_v23, %v278_v19  ;;  %v525_v26 = vpop.f32.mrb[9].mxu0  ;;  %v605_v27 = vpop.f32.mrb[9].mxu1 }
 0x10c   : > { %v652_v28 = vadd.f32 %v525_v26, %v261_v20  ;;  %v668_v29 = vadd.f32 %v605_v27, %v277_v21  ;;  %v717_v13 = vld [vmem:[#allocation2 + $0x28] sm:$0xff] (!%p978_p8)  ;;  %v785_v23 = vmax.f32 (!%p978_p8), %v753_v10, 0.0  ;;  %815 = vst [vmem:[%s1216_s7] sm:$0xff] (!%p978_p8), %v783_v16  ;;  %816 = vst [vmem:[%s1216_s7 + $0x8] sm:$0xff] (!%p978_p8), %v784_v17 }
 0x10d   : > { %685 = vst [vmem:[#allocation2 + $0x48] sm:$0xff] %v653_v24  ;;  %701 = vst [vmem:[#allocation2 + $0xc8] sm:$0xff] %v669_v25  ;;  %v716_v9 = vld [vmem:[#allocation2 + $0x20] sm:$0xff] (!%p978_p8)  ;;  %v756_v18 = vadd.f32 (!%p978_p8), %v1288_v3, %v717_v13  ;;  %v786_v24 = vmax.f32 (!%p978_p8), %v754_v11, 0.0 }
 0x10e   : > { %684 = vst [vmem:[#allocation2 + $0x40] sm:$0xff] %v652_v28  ;;  %700 = vst [vmem:[#allocation2 + $0xc0] sm:$0xff] %v668_v29  ;;  %v1034_v34 = vpop.f32.mrb[10].mxu0  ;;  %v1058_v35 = vpop.f32.mrb[10].mxu1  ;;  %v755_v12 = vadd.f32 (!%p978_p8), %v1288_v3, %v716_v9 }
 0x10f   : > { %v655_v36 = vadd.f32 %v1034_v34, %v264_v30  ;;  %v671_v37 = vadd.f32 %v1058_v35, %v280_v31  ;;  %v535_v38 = vpop.f32.mrb[11].mxu0  ;;  %v615_v39 = vpop.f32.mrb[11].mxu1  ;;  %v788_v30 = vmax.f32 (!%p978_p8), %v756_v18, 0.0  ;;  %817 = vst [vmem:[%s1216_s7 + $0x10] sm:$0xff] (!%p978_p8), %v785_v23  ;;  %818 = vst [vmem:[%s1216_s7 + $0x18] sm:$0xff] (!%p978_p8), %v786_v24 }
 0x110   : > { %v654_v40 = vadd.f32 %v535_v38, %v263_v32  ;;  %v670_v41 = vadd.f32 %v615_v39, %v279_v33  ;;  %v719_v15 = vld [vmem:[#allocation2 + $0x38] sm:$0xff] (!%p978_p8)  ;;  %v787_v25 = vmax.f32 (!%p978_p8), %v755_v12, 0.0 }
 0x111   : > { %687 = vst [vmem:[#allocation2 + $0x58] sm:$0xff] %v655_v36  ;;  %703 = vst [vmem:[#allocation2 + $0xd8] sm:$0xff] %v671_v37  ;;  %v718_v14 = vld [vmem:[#allocation2 + $0x30] sm:$0xff] (!%p978_p8)  ;;  %v758_v26 = vadd.f32 (!%p978_p8), %v1288_v3, %v719_v15 }
 0x112   : > { %686 = vst [vmem:[#allocation2 + $0x50] sm:$0xff] %v654_v40  ;;  %702 = vst [vmem:[#allocation2 + $0xd0] sm:$0xff] %v670_v41  ;;  %v1037_v46 = vpop.f32.mrb[12].mxu0  ;;  %v1061_v47 = vpop.f32.mrb[12].mxu1  ;;  %v757_v19 = vadd.f32 (!%p978_p8), %v1288_v3, %v718_v14  ;;  %v728_v40 = vld [vmem:[#allocation2 + $0x80] sm:$0xff] (!%p978_p8)  ;;  %v729_v41 = vld [vmem:[#allocation2 + $0x88] sm:$0xff] (!%p978_p8) }
 0x113   : > { %v657_v48 = vadd.f32 %v1037_v46, %v266_v42  ;;  %v673_v49 = vadd.f32 %v1061_v47, %v282_v43  ;;  %v545_v50 = vpop.f32.mrb[13].mxu0  ;;  %v625_v51 = vpop.f32.mrb[13].mxu1  ;;  %819 = vst [vmem:[%s1216_s7 + $0x20] sm:$0xff] (!%p978_p8), %v787_v25  ;;  %v790_v36 = vmax.f32 (!%p978_p8), %v758_v26, 0.0  ;;  %820 = vst [vmem:[%s1216_s7 + $0x28] sm:$0xff] (!%p978_p8), %v788_v30  ;;  %v730_v46 = vld [vmem:[#allocation2 + $0x90] sm:$0xff] (!%p978_p8) }
 0x114   : > { %v656_v52 = vadd.f32 %v545_v50, %v265_v44  ;;  %v672_v53 = vadd.f32 %v625_v51, %v281_v45  ;;  %711 = sbr.rel (%p978_p8) target bundleno = 296 (0x128), region = 40  ;;  %v721_v21 = vld [vmem:[#allocation2 + $0x48] sm:$0xff] (!%p978_p8)  ;;  %v789_v31 = vmax.f32 (!%p978_p8), %v757_v19, 0.0  ;;  %v731_v47 = vld [vmem:[#allocation2 + $0x98] sm:$0xff] (!%p978_p8) }
 0x115   : > { %689 = vst [vmem:[#allocation2 + $0x68] sm:$0xff] %v657_v48  ;;  %705 = vst [vmem:[#allocation2 + $0xe8] sm:$0xff] %v673_v49  ;;  %v720_v20 = vld [vmem:[#allocation2 + $0x40] sm:$0xff] (!%p978_p8)  ;;  %v760_v33 = vadd.f32 (!%p978_p8), %v1288_v3, %v721_v21 }
 0x116   : > { %688 = vst [vmem:[#allocation2 + $0x60] sm:$0xff] %v656_v52  ;;  %704 = vst [vmem:[#allocation2 + $0xe0] sm:$0xff] %v672_v53  ;;  %v1040_v58 = vpop.f32.mrb[14].mxu0  ;;  %v1064_v59 = vpop.f32.mrb[14].mxu1  ;;  %v759_v32 = vadd.f32 (!%p978_p8), %v1288_v3, %v720_v20  ;;  %v732_v48 = vld [vmem:[#allocation2 + $0xa0] sm:$0xff] (!%p978_p8)  ;;  %v733_v53 = vld [vmem:[#allocation2 + $0xa8] sm:$0xff] (!%p978_p8) }
 0x117   : > { %v659_v60 = vadd.f32 %v1040_v58, %v268_v54  ;;  %v675_v61 = vadd.f32 %v1064_v59, %v284_v55  ;;  %v555_v62 = vpop.f32.mrb[15].mxu0  ;;  %v635_v63 = vpop.f32.mrb[15].mxu1  ;;  %821 = vst [vmem:[%s1216_s7 + $0x30] sm:$0xff] (!%p978_p8), %v789_v31  ;;  %v792_v43 = vmax.f32 (!%p978_p8), %v760_v33, 0.0  ;;  %822 = vst [vmem:[%s1216_s7 + $0x38] sm:$0xff] (!%p978_p8), %v790_v36  ;;  %v734_v54 = vld [vmem:[#allocation2 + $0xb0] sm:$0xff] (!%p978_p8)  ;;  %v768_v58 = vadd.f32 (!%p978_p8), %v1288_v3, %v729_v41 }
 0x118   : > { %v658_v0 = vadd.f32 %v555_v62, %v267_v56  ;;  %v674_v1 = vadd.f32 %v635_v63, %v283_v57  ;;  %v723_v27 = vld [vmem:[#allocation2 + $0x58] sm:$0xff] (!%p978_p8)  ;;  %v791_v42 = vmax.f32 (!%p978_p8), %v759_v32, 0.0  ;;  %v767_v57 = vadd.f32 (!%p978_p8), %v1288_v3, %v728_v40 }
 0x119   : > { %691 = vst [vmem:[#allocation2 + $0x78] sm:$0xff] %v659_v60  ;;  %707 = vst [vmem:[#allocation2 + $0xf8] sm:$0xff] %v675_v61  ;;  %v722_v22 = vld [vmem:[#allocation2 + $0x50] sm:$0xff] (!%p978_p8)  ;;  %v762_v38 = vadd.f32 (!%p978_p8), %v1288_v3, %v723_v27  ;;  %v735_v59 = vld [vmem:[#allocation2 + $0xb8] sm:$0xff] (!%p978_p8)  ;;  %v769_v61 = vadd.f32 (!%p978_p8), %v1288_v3, %v730_v46  ;;  %v770_v62 = vadd.f32 (!%p978_p8), %v1288_v3, %v731_v47  ;;  %v800_v4 = vmax.f32 (!%p978_p8), %v768_v58, 0.0 }
 0x11a   : > { %690 = vst [vmem:[#allocation2 + $0x70] sm:$0xff] %v658_v0  ;;  %706 = vst [vmem:[#allocation2 + $0xf0] sm:$0xff] %v674_v1  ;;  %v761_v37 = vadd.f32 (!%p978_p8), %v1288_v3, %v722_v22  ;;  %v771_v63 = vadd.f32 (!%p978_p8), %v1288_v3, %v732_v48  ;;  %v736_v0 = vld [vmem:[#allocation2 + $0xc0] sm:$0xff] (!%p978_p8)  ;;  %v737_v1 = vld [vmem:[#allocation2 + $0xc8] sm:$0xff] (!%p978_p8)  ;;  %v799_v2 = vmax.f32 (!%p978_p8), %v767_v57, 0.0  ;;  %v772_v5 = vadd.f32 (!%p978_p8), %v1288_v3, %v733_v53 }
 0x11b   : > { %v794_v50 = vmax.f32 %v762_v38, 0.0  ;;  %823 = vst [vmem:[%s1216_s7 + $0x40] sm:$0xff] %v791_v42  ;;  %824 = vst [vmem:[%s1216_s7 + $0x48] sm:$0xff] %v792_v43  ;;  %v773_v6 = vadd.f32 %v1288_v3, %v734_v54  ;;  %v738_v7 = vld [vmem:[#allocation2 + $0xd0] sm:$0xff]  ;;  %v739_v8 = vld [vmem:[#allocation2 + $0xd8] sm:$0xff]  ;;  %v801_v10 = vmax.f32 %v769_v61, 0.0  ;;  %v774_v13 = vadd.f32 %v1288_v3, %v735_v59 }
 0x11c   : > { %v725_v29 = vld [vmem:[#allocation2 + $0x68] sm:$0xff]  ;;  %v793_v49 = vmax.f32 %v761_v37, 0.0  ;;  %v802_v11 = vmax.f32 %v770_v62, 0.0  ;;  %v803_v12 = vmax.f32 %v771_v63, 0.0  ;;  %831 = vst [vmem:[%s1216_s7 + $0x80] sm:$0xff] %v799_v2  ;;  %832 = vst [vmem:[%s1216_s7 + $0x88] sm:$0xff] %v800_v4  ;;  %v775_v18 = vadd.f32 %v1288_v3, %v736_v0 }
 0x11d   : > { %v724_v28 = vld [vmem:[#allocation2 + $0x60] sm:$0xff]  ;;  %v764_v44 = vadd.f32 %v1288_v3, %v725_v29  ;;  %826 = vst [vmem:[%s1216_s7 + $0x58] sm:$0xff] %v794_v50  ;;  %v741_v14 = vld [vmem:[#allocation2 + $0xe8] sm:$0xff]  ;;  %v804_v16 = vmax.f32 %v772_v5, 0.0  ;;  %v805_v17 = vmax.f32 %v773_v6, 0.0  ;;  %v776_v19 = vadd.f32 %v1288_v3, %v737_v1  ;;  %833 = vst [vmem:[%s1216_s7 + $0x90] sm:$0xff] %v801_v10 }
 0x11e   : > { %v763_v39 = vadd.f32 %v1288_v3, %v724_v28  ;;  %825 = vst [vmem:[%s1216_s7 + $0x50] sm:$0xff] %v793_v49  ;;  %v740_v9 = vld [vmem:[#allocation2 + $0xe0] sm:$0xff]  ;;  %834 = vst [vmem:[%s1216_s7 + $0x98] sm:$0xff] %v802_v11  ;;  %v806_v21 = vmax.f32 %v774_v13, 0.0  ;;  %v777_v22 = vadd.f32 %v1288_v3, %v738_v7  ;;  %v778_v23 = vadd.f32 %v1288_v3, %v739_v8 }
 0x11f   : > { %v796_v55 = vmax.f32 %v764_v44, 0.0  ;;  %835 = vst [vmem:[%s1216_s7 + $0xa0] sm:$0xff] %v803_v12  ;;  %v779_v24 = vadd.f32 %v1288_v3, %v740_v9  ;;  %836 = vst [vmem:[%s1216_s7 + $0xa8] sm:$0xff] %v804_v16  ;;  %v807_v25 = vmax.f32 %v775_v18, 0.0  ;;  %v808_v26 = vmax.f32 %v776_v19, 0.0 }
 0x120   : > { %v727_v35 = vld [vmem:[#allocation2 + $0x78] sm:$0xff]  ;;  %v795_v51 = vmax.f32 %v763_v39, 0.0  ;;  %837 = vst [vmem:[%s1216_s7 + $0xb0] sm:$0xff] %v805_v17  ;;  %v780_v27 = vadd.f32 %v1288_v3, %v741_v14  ;;  %838 = vst [vmem:[%s1216_s7 + $0xb8] sm:$0xff] %v806_v21  ;;  %v809_v29 = vmax.f32 %v777_v22, 0.0  ;;  %v810_v30 = vmax.f32 %v778_v23, 0.0 }
 0x121   : > { %v726_v34 = vld [vmem:[#allocation2 + $0x70] sm:$0xff]  ;;  %v766_v52 = vadd.f32 %v1288_v3, %v727_v35  ;;  %828 = vst [vmem:[%s1216_s7 + $0x68] sm:$0xff] %v796_v55  ;;  %v743_v20 = vld [vmem:[#allocation2 + $0xf8] sm:$0xff]  ;;  %v811_v31 = vmax.f32 %v779_v24, 0.0  ;;  %839 = vst [vmem:[%s1216_s7 + $0xc0] sm:$0xff] %v807_v25 }
 0x122   : > { %v765_v45 = vadd.f32 %v1288_v3, %v726_v34  ;;  %827 = vst [vmem:[%s1216_s7 + $0x60] sm:$0xff] %v795_v51  ;;  %v742_v15 = vld [vmem:[#allocation2 + $0xf0] sm:$0xff]  ;;  %v782_v32 = vadd.f32 %v1288_v3, %v743_v20  ;;  %840 = vst [vmem:[%s1216_s7 + $0xc8] sm:$0xff] %v808_v26  ;;  %v812_v33 = vmax.f32 %v780_v27, 0.0 }
 0x123   : > { %v798_v60 = vmax.f32 %v766_v52, 0.0  ;;  %v781_v28 = vadd.f32 %v1288_v3, %v742_v15  ;;  %841 = vst [vmem:[%s1216_s7 + $0xd0] sm:$0xff] %v809_v29  ;;  %842 = vst [vmem:[%s1216_s7 + $0xd8] sm:$0xff] %v810_v30 }
 0x124   : > { %v797_v56 = vmax.f32 %v765_v45, 0.0  ;;  %843 = vst [vmem:[%s1216_s7 + $0xe0] sm:$0xff] %v811_v31  ;;  %v814_v35 = vmax.f32 %v782_v32, 0.0  ;;  %844 = vst [vmem:[%s1216_s7 + $0xe8] sm:$0xff] %v812_v33 }
 0x125   : > { %830 = vst [vmem:[%s1216_s7 + $0x78] sm:$0xff] %v798_v60  ;;  %v813_v34 = vmax.f32 %v781_v28, 0.0 }
 0x126   : > { %829 = vst [vmem:[%s1216_s7 + $0x70] sm:$0xff] %v797_v56  ;;  %846 = vst [vmem:[%s1216_s7 + $0xf8] sm:$0xff] %v814_v35 }
 0x127   : > { %845 = vst [vmem:[%s1216_s7 + $0xf0] sm:$0xff] %v813_v34 }
 0x128 PF: > { %s13_s16 = sadd.s32 1, %s1146_s16   ;;  %s1373_s12 = smov %s1138_s14 }
 0x129   : > { %p10_p9 = scmp.ge.s32.totalorder %s13_s16, 20   ;;  %s1374_s13 = smov %s1142_s15 }
 0x12a   : > { %s1375_s14 = smov %s1378_s17  ;;  %s1376_s15 = smov %s1382_s18 }
 0x12b   :  { %12 = sbr.rel (!%p10_p9) target bundleno = 3 (0x3), region = 73 }

</bundles_post_ra>
